<compile_context>
chip_gen: v6e
topology: v6e:2x2x1
jax: 0.10.0
libtpu: 0.0.40
codegen_flags: <defaults>
</compile_context>

<pallas_src>
import numpy as np
import jax
import jax.numpy as jnp
from jax import lax
from jax.experimental import pallas as pl
from jax.experimental.pallas import tpu as pltpu

B, L, D, DFF = 2, 16, 32, 128          # batch, seq_len, d_model, d_ff (= 4*d_model)
DECOMP_RATIO = 0.1
LN_EPS = 1e-5                          # PyTorch LayerNorm default eps
NFREQ = L // 2 + 1                     # rfft bins


# ---------------------------------------------------------------------------
# Pallas kernel: one grid step processes NB batch elements (R = NB*L rows).
# ---------------------------------------------------------------------------
def _layernorm(h, g, b):
    mu = jnp.mean(h, axis=-1, keepdims=True)
    var = jnp.mean((h - mu) ** 2, axis=-1, keepdims=True)
    return (h - mu) * lax.rsqrt(var + LN_EPS) * g + b


def encoder_layer_kernel(x_ref, wcat_ref, mask_ref, w1_ref, w2_ref, vec_ref,
                         hp_ref, fwd_ref, inv_ref, out_ref, attn_ref):
    x = x_ref[...]                                               # (R, D) f32
    xb = x.astype(jnp.bfloat16)
    v = vec_ref[...]                                             # (8, D) packed vectors
    g1, b1 = v[0:1], v[1:2]
    g2, b2 = v[2:3], v[3:4]
    aw, ab = v[4:5], v[5:6]

    # ---- self-attention, folded projections:  [q | xv] = x @ [Wqk | Wvo] ----
    proj = jnp.dot(xb, wcat_ref[...], preferred_element_type=jnp.float32)  # (R, 2D)
    q = proj[:, :D]
    xv = proj[:, D:]
    scores = lax.dot_general(q.astype(jnp.bfloat16), xb,
                             (((1,), (1,)), ((), ())),
                             preferred_element_type=jnp.float32)           # (R, R)
    scores = scores + mask_ref[...]            # -1e30 on cross-batch entries
    scores = scores - jnp.max(scores, axis=-1, keepdims=True)
    e = jnp.exp(scores)                                                    # f32 VPU/EUP
    attn = e * pl.reciprocal(jnp.sum(e, axis=-1, keepdims=True), approx=True)
    attn_ref[...] = attn
    new_x = jnp.dot(attn.astype(jnp.bfloat16), xv.astype(jnp.bfloat16),
                    preferred_element_type=jnp.float32)                    # attn @ (x Wv Wo)

    # ---- x = norm1(x + new_x)   (dropout == identity at eval) ----
    h = _layernorm(x + new_x, g1, b1)

    # ---- decomp1: seasonal part via high-pass HP = I - lowpass (one matmul) ----
    xs = jnp.dot(hp_ref[...], h.astype(jnp.bfloat16),
                 preferred_element_type=jnp.float32)

    # ---- position-wise FFN (Conv1d k=1 == channel matmul), bf16 MXU path ----
    y = jnp.maximum(jnp.dot(xs.astype(jnp.bfloat16), w1_ref[...],
                            preferred_element_type=jnp.float32), 0.0)      # (R, DFF)
    y = jnp.dot(y.astype(jnp.bfloat16), w2_ref[...],
                preferred_element_type=jnp.float32)                        # (R, D)
    z = xs + y

    # ---- decomp2 ----
    res = jnp.dot(hp_ref[...], z.astype(jnp.bfloat16),
                  preferred_element_type=jnp.float32)

    # ---- APDC: stacked real-DFT fwd, sigmoid gate on |X|, merged irfft ----
    ft = inv_ref.shape[1] // 2
    spec = jnp.dot(fwd_ref[...], res.astype(jnp.bfloat16),
                   preferred_element_type=jnp.float32)                     # (2ft, D)
    xr = spec[:ft]                       # sublane-aligned static slices (ft % 8 == 0)
    xi = spec[ft:]
    mag = jnp.sqrt(xr * xr + xi * xi)
    gate = jax.nn.sigmoid(mag * aw + ab)                                   # (ft, D) f32
    gated = spec * jnp.concatenate([gate, gate], axis=0)                   # (2ft, D)
    den = jnp.dot(inv_ref[...], gated.astype(jnp.bfloat16),
                  preferred_element_type=jnp.float32)                      # (R, D)

    # ---- norm2 ----
    out_ref[...] = _layernorm(res + den, g2, b2)


# ---------------------------------------------------------------------------
# Host-side spectral matrices (numpy, deterministic)
# ---------------------------------------------------------------------------
def _lowpass_matrix(length, ratio):
    kk = max(1, int(ratio * length))
    f = np.arange(length)
    keep = ((f < kk) | (f > length - kk)).astype(np.complex128)
    dft = np.fft.fft(np.eye(length), axis=0)
    return np.real(np.fft.ifft(keep[:, None] * dft, axis=0))              # (L, L)


def _rfft_matrices(length):
    nf = length // 2 + 1
    n = np.arange(length)
    f = np.arange(nf)
    ang_f = 2.0 * np.pi * np.outer(f, n) / length                         # (F, L)
    cr = np.cos(ang_f)
    ci = -np.sin(ang_f)
    s = np.full((nf,), 2.0)
    s[0] = 1.0
    if length % 2 == 0:
        s[-1] = 1.0
    ang_i = 2.0 * np.pi * np.outer(n, f) / length                         # (L, F)
    ir = (s[None, :] * np.cos(ang_i)) / length
    ii = -(s[None, :] * np.sin(ang_i)) / length
    return cr, ci, ir, ii


def _block_diag(block, n):
    r, c = block.shape
    out = np.zeros((n * r, n * c), block.dtype)
    for i in range(n):
        out[i * r:(i + 1) * r, i * c:(i + 1) * c] = block
    return out


def _prepare_kernel_params(params, nb):
    wq, wk, wv, wo, w1, w2, g1, b1, g2, b2, aw, ab = params
    wq64, wk64, wv64, wo64 = (np.asarray(t, np.float64) for t in (wq, wk, wv, wo))

    # Folded attention weights: one (D, 2D) matrix  [ Wq Wk^T / sqrt(D) | Wv Wo ].
    wqk = wq64 @ wk64.T / np.sqrt(D)
    wvo = wv64 @ wo64
    wcat = jnp.asarray(np.concatenate([wqk, wvo], axis=1), jnp.bfloat16)   # (D, 2D)
    w1b = jnp.asarray(np.asarray(w1), jnp.bfloat16)                        # (D, DFF)
    w2b = jnp.asarray(np.asarray(w2), jnp.bfloat16)                        # (DFF, D)

    nbl = nb * L
    bid = np.repeat(np.arange(nb), L)
    mask = np.where(bid[:, None] == bid[None, :], 0.0, -1e30).astype(np.float32)

    hp1 = np.eye(L) - _lowpass_matrix(L, DECOMP_RATIO)           # high-pass (L, L)
    hp = _block_diag(hp1, nb)                                    # (nbl, nbl)

    cr, ci, ir, ii = _rfft_matrices(L)
    nf = nb * NFREQ
    ft = -(-nf // 8) * 8                                         # pad to sublane tile
    fwd = np.zeros((2 * ft, nbl))
    fwd[:nf, :] = _block_diag(cr, nb)
    fwd[ft:ft + nf, :] = _block_diag(ci, nb)
    inv = np.zeros((nbl, 2 * ft))                                # merged [ir | ii]
    inv[:, :nf] = _block_diag(ir, nb)
    inv[:, ft:ft + nf] = _block_diag(ii, nb)

    # Pack the six (1, D) vectors into one (8, D) input (rows 0..5 used).
    vecs = np.zeros((8, D), np.float32)
    for row, t in enumerate((g1, b1, g2, b2, aw, ab)):
        vecs[row] = np.asarray(t, np.float32).reshape(-1)

    return [wcat,
            jnp.asarray(mask, jnp.float32),
            w1b, w2b,
            jnp.asarray(vecs, jnp.float32),
            jnp.asarray(hp, jnp.bfloat16),
            jnp.asarray(fwd, jnp.bfloat16),
            jnp.asarray(inv, jnp.bfloat16)]


# ---------------------------------------------------------------------------
# Wrapper
# ---------------------------------------------------------------------------
def encoder_layer(x, params, nb=None):
    # Fuse the whole batch into ONE grid step on all generations: at this size
    # per-core work is a few µs, so splitting across TensorCores (v7x) only
    # duplicates weight DMAs and pipeline prologues and halves sublane fill.
    if nb is None:
        nb = B
    assert B % nb == 0
    grid = B // nb
    nbl = nb * L
    ft = -(-(nb * NFREQ) // 8) * 8
    # VMEM cap for the quadratic fused-batch buffers (mask + scores + attn),
    # relevant on v7x (64 MiB physical / 32 MiB default scoped VMEM).
    assert 3 * (nbl ** 2) * 4 < 8 * (1 << 20), "fused batch too large; lower nb"

    kparams = _prepare_kernel_params(params, nb)
    xf = x.reshape(B * L, D)

    def weight_spec(p):
        nd = p.ndim
        return pl.BlockSpec(p.shape, lambda g, _nd=nd: (0,) * _nd)

    in_specs = ([pl.BlockSpec((nbl, D), lambda g: (g, 0))] +
                [weight_spec(p) for p in kparams])
    out_specs = [pl.BlockSpec((nbl, D), lambda g: (g, 0)),
                 pl.BlockSpec((None, nbl, nbl), lambda g: (g, 0, 0))]
    out_shape = (jax.ShapeDtypeStruct((B * L, D), jnp.float32),
                 jax.ShapeDtypeStruct((grid, nbl, nbl), jnp.float32))

    flops_step = (2 * nbl * D * (2 * D)            # fused projection
                  + 4 * nbl * nbl * D              # scores + attn@xv
                  + 4 * nbl * nbl * D              # two high-pass matmuls
                  + 4 * nbl * D * DFF              # FFN
                  + 8 * ft * nbl * D)              # fwd DFT + merged inverse
    trans_step = nbl * nbl + 2 * ft * D + 3 * nbl
    bytes_step = int(4 * (2 * nbl * D + 2 * nbl * nbl) +
                     sum(int(p.size) * p.dtype.itemsize for p in kparams))
    cost = pl.CostEstimate(flops=grid * flops_step,
                           transcendentals=grid * trans_step,
                           bytes_accessed=grid * bytes_step)

    out_flat, attn_raw = pl.pallas_call(
        encoder_layer_kernel,
        out_shape=out_shape,
        grid_spec=pltpu.PrefetchScalarGridSpec(
            num_scalar_prefetch=0,
            grid=(grid,),
            in_specs=in_specs,
            out_specs=out_specs),
        compiler_params=pltpu.CompilerParams(
            dimension_semantics=("parallel",)),
        cost_estimate=cost,
    )(xf, *kparams)

    out = out_flat.reshape(B, L, D)
    # Per-batch attention matrices are the diagonal (L, L) blocks of each
    # step's masked-softmax matrix; extract them with cheap XLA slices.
    blocks = []
    for g in range(grid):
        for i in range(nb):
            blocks.append(attn_raw[g, i * L:(i + 1) * L, i * L:(i + 1) * L])
    attn = jnp.stack(blocks, axis=0)
    return out, attn


# ---------------------------------------------------------------------------
# Deterministic module parameters
# ---------------------------------------------------------------------------
def make_params(key):
    ks = jax.random.split(key, 7)
    sd = 1.0 / np.sqrt(D)
    wq = jax.random.normal(ks[0], (D, D), jnp.float32) * sd
    wk = jax.random.normal(ks[1], (D, D), jnp.float32) * sd
    wv = jax.random.normal(ks[2], (D, D), jnp.float32) * sd
    wo = jax.random.normal(ks[3], (D, D), jnp.float32) * sd
    # conv1 weight (d_ff, d_model, 1) stored transposed as (D, DFF); conv2 as (DFF, D)
    w1 = jax.random.normal(ks[4], (D, DFF), jnp.float32) * sd
    w2 = jax.random.normal(ks[5], (DFF, D), jnp.float32) * (1.0 / np.sqrt(DFF))
    g1 = jnp.ones((1, D), jnp.float32)
    b1 = jnp.zeros((1, D), jnp.float32)
    g2 = jnp.ones((1, D), jnp.float32)
    b2 = jnp.zeros((1, D), jnp.float32)
    aw = jax.random.normal(ks[6], (1, D), jnp.float32) * 0.1
    ab = jnp.zeros((1, D), jnp.float32)
    return (wq, wk, wv, wo, w1, w2, g1, b1, g2, b2, aw, ab)


# ---------------------------------------------------------------------------
# Pure-JAX reference (real jnp.fft, un-folded weights, highest precision)
# ---------------------------------------------------------------------------
def reference(x, params):
    wq, wk, wv, wo, w1, w2, g1, b1, g2, b2, aw, ab = params

    def ln(h, g, b):
        mu = h.mean(-1, keepdims=True)
        var = ((h - mu) ** 2).mean(-1, keepdims=True)
        return (h - mu) / jnp.sqrt(var + LN_EPS) * g + b

    def lowpass(u):
        kk = max(1, int(DECOMP_RATIO * L))
        freqs = jnp.arange(L)
        m = (freqs < kk) | (freqs > L - kk)
        U = jnp.fft.fft(u, axis=1) * m[None, :, None]
        return jnp.real(jnp.fft.ifft(U, axis=1))

    with jax.default_matmul_precision("highest"):
        q, k, v = x @ wq, x @ wk, x @ wv
        scores = jnp.einsum('bld,bmd->blm', q, k) / np.sqrt(D)
        attn = jax.nn.softmax(scores, axis=-1)
        new_x = jnp.einsum('blm,bmd->bld', attn, v) @ wo
        h = ln(x + new_x, g1, b1)
        xs = h - lowpass(h)
        y = jnp.maximum(xs @ w1, 0.0) @ w2
        z = xs + y
        res = z - lowpass(z)
        X = jnp.fft.rfft(res, axis=1)
        gate = jax.nn.sigmoid(jnp.abs(X) * aw + ab)
        den = jnp.fft.irfft(X * gate, n=L, axis=1)
        res = res + den
        return ln(res, g2, b2), attn


if __name__ == "__main__":
    key = jax.random.PRNGKey(0)
    kx, kp = jax.random.split(key)
    x = jax.random.normal(kx, (B, L, D), jnp.float32)
    params = make_params(kp)

    out, attn = encoder_layer(x, params)
    jax.block_until_ready((out, attn))

    ref_out, ref_attn = reference(x, params)
    err_out = float(jnp.max(jnp.abs(out - ref_out)))
    err_attn = float(jnp.max(jnp.abs(attn - ref_attn)))
    assert out.shape == (B, L, D) and attn.shape == (B, L, L)
    assert bool(jnp.all(jnp.isfinite(out))) and bool(jnp.all(jnp.isfinite(attn)))
    # Tolerances account for bf16 matmul operands across the whole fused chain
    # (f32 accumulation); attn sees only two bf16 matmuls so it stays tighter.
    assert err_attn < 5e-2, f"attn mismatch vs reference: {err_attn}"
    assert err_out < 1e-1, f"output mismatch vs reference: {err_out}"
    print("KERNEL_OK")
</pallas_src>

<mosaic_0001>
module attributes {stable_mosaic.version = 11 : i64} {
  func.func @encoder_layer_kernel(%arg0: i32, %arg1: memref<32x32xf32, #tpu.memory_space<vmem>>, %arg2: memref<32x64xbf16, #tpu.memory_space<vmem>>, %arg3: memref<32x32xf32, #tpu.memory_space<vmem>>, %arg4: memref<32x128xbf16, #tpu.memory_space<vmem>>, %arg5: memref<128x32xbf16, #tpu.memory_space<vmem>>, %arg6: memref<8x32xf32, #tpu.memory_space<vmem>>, %arg7: memref<32x32xbf16, #tpu.memory_space<vmem>>, %arg8: memref<48x32xbf16, #tpu.memory_space<vmem>>, %arg9: memref<32x48xbf16, #tpu.memory_space<vmem>>, %arg10: memref<32x32xf32, #tpu.memory_space<vmem>>, %arg11: memref<1x32x32xf32, #tpu.memory_space<vmem>>) attributes {dimension_semantics = [#tpu.dimension_semantics<parallel>], iteration_bounds = array<i64: 1>, scalar_prefetch = 0 : i64, scratch_operands = 0 : i64, tpu.core_type = #tpu.core_type<tc>, window_params = [{transform_indices = @transform_0, window_bounds = array<i64: 32, 32>}, {pipeline_mode = #tpu.pipeline_mode<synchronous>, transform_indices = @transform_1, window_bounds = array<i64: 32, 64>}, {pipeline_mode = #tpu.pipeline_mode<synchronous>, transform_indices = @transform_2, window_bounds = array<i64: 32, 32>}, {pipeline_mode = #tpu.pipeline_mode<synchronous>, transform_indices = @transform_3, window_bounds = array<i64: 32, 128>}, {pipeline_mode = #tpu.pipeline_mode<synchronous>, transform_indices = @transform_4, window_bounds = array<i64: 128, 32>}, {pipeline_mode = #tpu.pipeline_mode<synchronous>, transform_indices = @transform_5, window_bounds = array<i64: 8, 32>}, {pipeline_mode = #tpu.pipeline_mode<synchronous>, transform_indices = @transform_6, window_bounds = array<i64: 32, 32>}, {pipeline_mode = #tpu.pipeline_mode<synchronous>, transform_indices = @transform_7, window_bounds = array<i64: 48, 32>}, {pipeline_mode = #tpu.pipeline_mode<synchronous>, transform_indices = @transform_8, window_bounds = array<i64: 32, 48>}, {transform_indices = @transform_9, window_bounds = array<i64: 32, 32>}, {transform_indices = @transform_10, window_bounds = array<i64: 1, 32, 32>}]} {
    %c0 = arith.constant 0 : index
    %c0_0 = arith.constant 0 : index
    %0 = vector.load %arg1[%c0, %c0_0] : memref<32x32xf32, #tpu.memory_space<vmem>>, vector<32x32xf32>
    %1 = arith.truncf %0 : vector<32x32xf32> to vector<32x32xbf16>
    %c0_1 = arith.constant 0 : index
    %c0_2 = arith.constant 0 : index
    %2 = vector.load %arg6[%c0_1, %c0_2] : memref<8x32xf32, #tpu.memory_space<vmem>>, vector<8x32xf32>
    %3 = vector.extract_strided_slice %2 {offsets = [0, 0], sizes = [1, 32], strides = [1, 1]} : vector<8x32xf32> to vector<1x32xf32>
    %4 = vector.extract_strided_slice %2 {offsets = [1, 0], sizes = [1, 32], strides = [1, 1]} : vector<8x32xf32> to vector<1x32xf32>
    %5 = vector.extract_strided_slice %2 {offsets = [2, 0], sizes = [1, 32], strides = [1, 1]} : vector<8x32xf32> to vector<1x32xf32>
    %6 = vector.extract_strided_slice %2 {offsets = [3, 0], sizes = [1, 32], strides = [1, 1]} : vector<8x32xf32> to vector<1x32xf32>
    %7 = vector.extract_strided_slice %2 {offsets = [4, 0], sizes = [1, 32], strides = [1, 1]} : vector<8x32xf32> to vector<1x32xf32>
    %8 = vector.extract_strided_slice %2 {offsets = [5, 0], sizes = [1, 32], strides = [1, 1]} : vector<8x32xf32> to vector<1x32xf32>
    %c0_3 = arith.constant 0 : index
    %c0_4 = arith.constant 0 : index
    %9 = vector.load %arg2[%c0_3, %c0_4] : memref<32x64xbf16, #tpu.memory_space<vmem>>, vector<32x64xbf16>
    %cst = arith.constant dense<0.000000e+00> : vector<32x64xf32>
    %10 = tpu.matmul %1, %9, %cst {dimension_numbers = #tpu.dot_dimension_numbers<[1], [0], [0], [1], [0, 0, 1, 1], [], []>} : vector<32x32xbf16>, vector<32x64xbf16>, vector<32x64xf32> -> vector<32x64xf32>
    %11 = vector.extract_strided_slice %10 {offsets = [0, 0], sizes = [32, 32], strides = [1, 1]} : vector<32x64xf32> to vector<32x32xf32>
    %12 = vector.extract_strided_slice %10 {offsets = [0, 32], sizes = [32, 32], strides = [1, 1]} : vector<32x64xf32> to vector<32x32xf32>
    %13 = arith.truncf %11 : vector<32x32xf32> to vector<32x32xbf16>
    %cst_5 = arith.constant dense<0.000000e+00> : vector<32x32xf32>
    %14 = tpu.matmul %13, %1, %cst_5 {dimension_numbers = #tpu.dot_dimension_numbers<[1], [1], [0], [0], [0, 0, 1, 0], [], []>} : vector<32x32xbf16>, vector<32x32xbf16>, vector<32x32xf32> -> vector<32x32xf32>
    %c0_6 = arith.constant 0 : index
    %c0_7 = arith.constant 0 : index
    %15 = vector.load %arg3[%c0_6, %c0_7] : memref<32x32xf32, #tpu.memory_space<vmem>>, vector<32x32xf32>
    %16 = arith.addf %14, %15 : vector<32x32xf32>
    %cst_8 = arith.constant dense<0xFF800000> : vector<32xf32>
    %17 = vector.multi_reduction <maximumf>, %16, %cst_8 [1] : vector<32x32xf32> to vector<32xf32>
    %18 = vector.shape_cast %17 : vector<32xf32> to vector<32x1xf32>
    %19 = vector.broadcast %18 : vector<32x1xf32> to vector<32x32xf32>
    %20 = arith.subf %16, %19 : vector<32x32xf32>
    %21 = math.exp %20 : vector<32x32xf32>
    %cst_9 = arith.constant dense<0.000000e+00> : vector<32xf32>
    %22 = vector.multi_reduction <add>, %21, %cst_9 [1] : vector<32x32xf32> to vector<32xf32>
    %23 = vector.shape_cast %22 : vector<32xf32> to vector<32x1xf32>
    %24 = tpu.reciprocal %23 {approx = true} : vector<32x1xf32> -> vector<32x1xf32>
    %25 = vector.broadcast %24 : vector<32x1xf32> to vector<32x32xf32>
    %26 = arith.mulf %21, %25 : vector<32x32xf32>
    %c0_10 = arith.constant 0 : index
    %c0_11 = arith.constant 0 : index
    %c0_12 = arith.constant 0 : index
    %27 = vector.load %arg11[%c0_10, %c0_11, %c0_12] : memref<1x32x32xf32, #tpu.memory_space<vmem>>, vector<1x32x32xf32>
    %28 = vector.shape_cast %27 : vector<1x32x32xf32> to vector<32x32xf32>
    %29 = vector.shape_cast %26 : vector<32x32xf32> to vector<1x32x32xf32>
    tpu.vector_store %arg11[%c0_10, %c0_11, %c0_12], %29 {strides = array<i32>} : memref<1x32x32xf32, #tpu.memory_space<vmem>>, vector<1x32x32xf32>,
    %30 = arith.truncf %26 : vector<32x32xf32> to vector<32x32xbf16>
    %31 = arith.truncf %12 : vector<32x32xf32> to vector<32x32xbf16>
    %cst_13 = arith.constant dense<0.000000e+00> : vector<32x32xf32>
    %32 = tpu.matmul %30, %31, %cst_13 {dimension_numbers = #tpu.dot_dimension_numbers<[1], [0], [0], [1], [0, 0, 1, 1], [], []>} : vector<32x32xbf16>, vector<32x32xbf16>, vector<32x32xf32> -> vector<32x32xf32>
    %33 = arith.addf %0, %32 : vector<32x32xf32>
    %cst_14 = arith.constant dense<0.000000e+00> : vector<32xf32>
    %34 = vector.multi_reduction <add>, %33, %cst_14 [1] : vector<32x32xf32> to vector<32xf32>
    %35 = vector.shape_cast %34 : vector<32xf32> to vector<32x1xf32>
    %cst_15 = arith.constant 3.200000e+01 : f32
    %36 = vector.broadcast %cst_15 : f32 to vector<32x1xf32>
    %37 = arith.divf %35, %36 : vector<32x1xf32>
    %38 = vector.broadcast %37 : vector<32x1xf32> to vector<32x32xf32>
    %39 = arith.subf %33, %38 : vector<32x32xf32>
    %40 = arith.mulf %39, %39 : vector<32x32xf32>
    %cst_16 = arith.constant dense<0.000000e+00> : vector<32xf32>
    %41 = vector.multi_reduction <add>, %40, %cst_16 [1] : vector<32x32xf32> to vector<32xf32>
    %42 = vector.shape_cast %41 : vector<32xf32> to vector<32x1xf32>
    %cst_17 = arith.constant 3.200000e+01 : f32
    %43 = vector.broadcast %cst_17 : f32 to vector<32x1xf32>
    %44 = arith.divf %42, %43 : vector<32x1xf32>
    %45 = vector.broadcast %37 : vector<32x1xf32> to vector<32x32xf32>
    %46 = arith.subf %33, %45 : vector<32x32xf32>
    %cst_18 = arith.constant 9.99999974E-6 : f32
    %47 = vector.broadcast %cst_18 : f32 to vector<32x1xf32>
    %48 = arith.addf %44, %47 : vector<32x1xf32>
    %49 = math.rsqrt %48 : vector<32x1xf32>
    %50 = vector.broadcast %49 : vector<32x1xf32> to vector<32x32xf32>
    %51 = arith.mulf %46, %50 : vector<32x32xf32>
    %52 = vector.broadcast %3 : vector<1x32xf32> to vector<32x32xf32>
    %53 = arith.mulf %51, %52 : vector<32x32xf32>
    %54 = vector.broadcast %4 : vector<1x32xf32> to vector<32x32xf32>
    %55 = arith.addf %53, %54 : vector<32x32xf32>
    %c0_19 = arith.constant 0 : index
    %c0_20 = arith.constant 0 : index
    %56 = vector.load %arg7[%c0_19, %c0_20] : memref<32x32xbf16, #tpu.memory_space<vmem>>, vector<32x32xbf16>
    %57 = arith.truncf %55 : vector<32x32xf32> to vector<32x32xbf16>
    %cst_21 = arith.constant dense<0.000000e+00> : vector<32x32xf32>
    %58 = tpu.matmul %56, %57, %cst_21 {dimension_numbers = #tpu.dot_dimension_numbers<[1], [0], [0], [1], [0, 0, 1, 1], [], []>} : vector<32x32xbf16>, vector<32x32xbf16>, vector<32x32xf32> -> vector<32x32xf32>
    %59 = arith.truncf %58 : vector<32x32xf32> to vector<32x32xbf16>
    %c0_22 = arith.constant 0 : index
    %c0_23 = arith.constant 0 : index
    %60 = vector.load %arg4[%c0_22, %c0_23] : memref<32x128xbf16, #tpu.memory_space<vmem>>, vector<32x128xbf16>
    %cst_24 = arith.constant dense<0.000000e+00> : vector<32x128xf32>
    %61 = tpu.matmul %59, %60, %cst_24 {dimension_numbers = #tpu.dot_dimension_numbers<[1], [0], [0], [1], [0, 0, 1, 1], [], []>} : vector<32x32xbf16>, vector<32x128xbf16>, vector<32x128xf32> -> vector<32x128xf32>
    %cst_25 = arith.constant 0.000000e+00 : f32
    %62 = vector.broadcast %cst_25 : f32 to vector<32x128xf32>
    %63 = arith.maximumf %61, %62 : vector<32x128xf32>
    %64 = arith.truncf %63 : vector<32x128xf32> to vector<32x128xbf16>
    %c0_26 = arith.constant 0 : index
    %c0_27 = arith.constant 0 : index
    %65 = vector.load %arg5[%c0_26, %c0_27] : memref<128x32xbf16, #tpu.memory_space<vmem>>, vector<128x32xbf16>
    %cst_28 = arith.constant dense<0.000000e+00> : vector<32x32xf32>
    %66 = tpu.matmul %64, %65, %cst_28 {dimension_numbers = #tpu.dot_dimension_numbers<[1], [0], [0], [1], [0, 0, 1, 1], [], []>} : vector<32x128xbf16>, vector<128x32xbf16>, vector<32x32xf32> -> vector<32x32xf32>
    %67 = arith.addf %58, %66 : vector<32x32xf32>
    %c0_29 = arith.constant 0 : index
    %c0_30 = arith.constant 0 : index
    %68 = vector.load %arg7[%c0_29, %c0_30] : memref<32x32xbf16, #tpu.memory_space<vmem>>, vector<32x32xbf16>
    %69 = arith.truncf %67 : vector<32x32xf32> to vector<32x32xbf16>
    %cst_31 = arith.constant dense<0.000000e+00> : vector<32x32xf32>
    %70 = tpu.matmul %68, %69, %cst_31 {dimension_numbers = #tpu.dot_dimension_numbers<[1], [0], [0], [1], [0, 0, 1, 1], [], []>} : vector<32x32xbf16>, vector<32x32xbf16>, vector<32x32xf32> -> vector<32x32xf32>
    %c0_32 = arith.constant 0 : index
    %c0_33 = arith.constant 0 : index
    %71 = vector.load %arg8[%c0_32, %c0_33] : memref<48x32xbf16, #tpu.memory_space<vmem>>, vector<48x32xbf16>
    %72 = arith.truncf %70 : vector<32x32xf32> to vector<32x32xbf16>
    %cst_34 = arith.constant dense<0.000000e+00> : vector<48x32xf32>
    %73 = tpu.matmul %71, %72, %cst_34 {dimension_numbers = #tpu.dot_dimension_numbers<[1], [0], [0], [1], [0, 0, 1, 1], [], []>} : vector<48x32xbf16>, vector<32x32xbf16>, vector<48x32xf32> -> vector<48x32xf32>
    %74 = vector.extract_strided_slice %73 {offsets = [0, 0], sizes = [24, 32], strides = [1, 1]} : vector<48x32xf32> to vector<24x32xf32>
    %75 = vector.extract_strided_slice %73 {offsets = [24, 0], sizes = [24, 32], strides = [1, 1]} : vector<48x32xf32> to vector<24x32xf32>
    %76 = arith.mulf %74, %74 : vector<24x32xf32>
    %77 = arith.mulf %75, %75 : vector<24x32xf32>
    %78 = arith.addf %76, %77 : vector<24x32xf32>
    %79 = math.sqrt %78 : vector<24x32xf32>
    %80 = vector.broadcast %7 : vector<1x32xf32> to vector<24x32xf32>
    %81 = arith.mulf %79, %80 : vector<24x32xf32>
    %82 = vector.broadcast %8 : vector<1x32xf32> to vector<24x32xf32>
    %83 = arith.addf %81, %82 : vector<24x32xf32>
    %84 = arith.negf %83 : vector<24x32xf32>
    %85 = math.exp %84 : vector<24x32xf32>
    %cst_35 = arith.constant 1.000000e+00 : f32
    %86 = vector.broadcast %cst_35 : f32 to vector<24x32xf32>
    %87 = arith.addf %86, %85 : vector<24x32xf32>
    %88 = arith.divf %86, %87 : vector<24x32xf32>
    %89 = tpu.concatenate %88, %88 in 0 : vector<24x32xf32>, vector<24x32xf32> -> vector<48x32xf32>
    %90 = arith.mulf %73, %89 : vector<48x32xf32>
    %c0_36 = arith.constant 0 : index
    %c0_37 = arith.constant 0 : index
    %91 = vector.load %arg9[%c0_36, %c0_37] : memref<32x48xbf16, #tpu.memory_space<vmem>>, vector<32x48xbf16>
    %92 = arith.truncf %90 : vector<48x32xf32> to vector<48x32xbf16>
    %cst_38 = arith.constant dense<0.000000e+00> : vector<32x32xf32>
    %93 = tpu.matmul %91, %92, %cst_38 {dimension_numbers = #tpu.dot_dimension_numbers<[1], [0], [0], [1], [0, 0, 1, 1], [], []>} : vector<32x48xbf16>, vector<48x32xbf16>, vector<32x32xf32> -> vector<32x32xf32>
    %94 = arith.addf %70, %93 : vector<32x32xf32>
    %cst_39 = arith.constant dense<0.000000e+00> : vector<32xf32>
    %95 = vector.multi_reduction <add>, %94, %cst_39 [1] : vector<32x32xf32> to vector<32xf32>
    %96 = vector.shape_cast %95 : vector<32xf32> to vector<32x1xf32>
    %cst_40 = arith.constant 3.200000e+01 : f32
    %97 = vector.broadcast %cst_40 : f32 to vector<32x1xf32>
    %98 = arith.divf %96, %97 : vector<32x1xf32>
    %99 = vector.broadcast %98 : vector<32x1xf32> to vector<32x32xf32>
    %100 = arith.subf %94, %99 : vector<32x32xf32>
    %101 = arith.mulf %100, %100 : vector<32x32xf32>
    %cst_41 = arith.constant dense<0.000000e+00> : vector<32xf32>
    %102 = vector.multi_reduction <add>, %101, %cst_41 [1] : vector<32x32xf32> to vector<32xf32>
    %103 = vector.shape_cast %102 : vector<32xf32> to vector<32x1xf32>
    %cst_42 = arith.constant 3.200000e+01 : f32
    %104 = vector.broadcast %cst_42 : f32 to vector<32x1xf32>
    %105 = arith.divf %103, %104 : vector<32x1xf32>
    %106 = vector.broadcast %98 : vector<32x1xf32> to vector<32x32xf32>
    %107 = arith.subf %94, %106 : vector<32x32xf32>
    %cst_43 = arith.constant 9.99999974E-6 : f32
    %108 = vector.broadcast %cst_43 : f32 to vector<32x1xf32>
    %109 = arith.addf %105, %108 : vector<32x1xf32>
    %110 = math.rsqrt %109 : vector<32x1xf32>
    %111 = vector.broadcast %110 : vector<32x1xf32> to vector<32x32xf32>
    %112 = arith.mulf %107, %111 : vector<32x32xf32>
    %113 = vector.broadcast %5 : vector<1x32xf32> to vector<32x32xf32>
    %114 = arith.mulf %112, %113 : vector<32x32xf32>
    %115 = vector.broadcast %6 : vector<1x32xf32> to vector<32x32xf32>
    %116 = arith.addf %114, %115 : vector<32x32xf32>
    %c0_44 = arith.constant 0 : index
    %c0_45 = arith.constant 0 : index
    %117 = vector.load %arg10[%c0_44, %c0_45] : memref<32x32xf32, #tpu.memory_space<vmem>>, vector<32x32xf32>
    tpu.vector_store %arg10[%c0_44, %c0_45], %116 {strides = array<i32>} : memref<32x32xf32, #tpu.memory_space<vmem>>, vector<32x32xf32>,
    return
  }
  func.func @transform_0(%arg0: i32) -> (i32, i32) {
    %c0_i32 = arith.constant 0 : i32
    %c0_i32_0 = arith.constant 0 : i32
    return %arg0, %c0_i32 : i32, i32
  }
  func.func @transform_1(%arg0: i32) -> (i32, i32) {
    %c0_i32 = arith.constant 0 : i32
    %c0_i32_0 = arith.constant 0 : i32
    %c0_i32_1 = arith.constant 0 : i32
    return %c0_i32, %c0_i32_0 : i32, i32
  }
  func.func @transform_2(%arg0: i32) -> (i32, i32) {
    %c0_i32 = arith.constant 0 : i32
    %c0_i32_0 = arith.constant 0 : i32
    %c0_i32_1 = arith.constant 0 : i32
    return %c0_i32, %c0_i32_0 : i32, i32
  }
  func.func @transform_3(%arg0: i32) -> (i32, i32) {
    %c0_i32 = arith.constant 0 : i32
    %c0_i32_0 = arith.constant 0 : i32
    %c0_i32_1 = arith.constant 0 : i32
    return %c0_i32, %c0_i32_0 : i32, i32
  }
  func.func @transform_4(%arg0: i32) -> (i32, i32) {
    %c0_i32 = arith.constant 0 : i32
    %c0_i32_0 = arith.constant 0 : i32
    %c0_i32_1 = arith.constant 0 : i32
    return %c0_i32, %c0_i32_0 : i32, i32
  }
  func.func @transform_5(%arg0: i32) -> (i32, i32) {
    %c0_i32 = arith.constant 0 : i32
    %c0_i32_0 = arith.constant 0 : i32
    %c0_i32_1 = arith.constant 0 : i32
    return %c0_i32, %c0_i32_0 : i32, i32
  }
  func.func @transform_6(%arg0: i32) -> (i32, i32) {
    %c0_i32 = arith.constant 0 : i32
    %c0_i32_0 = arith.constant 0 : i32
    %c0_i32_1 = arith.constant 0 : i32
    return %c0_i32, %c0_i32_0 : i32, i32
  }
  func.func @transform_7(%arg0: i32) -> (i32, i32) {
    %c0_i32 = arith.constant 0 : i32
    %c0_i32_0 = arith.constant 0 : i32
    %c0_i32_1 = arith.constant 0 : i32
    return %c0_i32, %c0_i32_0 : i32, i32
  }
  func.func @transform_8(%arg0: i32) -> (i32, i32) {
    %c0_i32 = arith.constant 0 : i32
    %c0_i32_0 = arith.constant 0 : i32
    %c0_i32_1 = arith.constant 0 : i32
    return %c0_i32, %c0_i32_0 : i32, i32
  }
  func.func @transform_9(%arg0: i32) -> (i32, i32) {
    %c0_i32 = arith.constant 0 : i32
    %c0_i32_0 = arith.constant 0 : i32
    return %arg0, %c0_i32 : i32, i32
  }
  func.func @transform_10(%arg0: i32) -> (i32, i32, i32) {
    %c0_i32 = arith.constant 0 : i32
    %c0_i32_0 = arith.constant 0 : i32
    %c0_i32_1 = arith.constant 0 : i32
    return %arg0, %c0_i32, %c0_i32_0 : i32, i32, i32
  }
}

</mosaic_0001>

<bundles_post_ra>
// kernel: tpu_custom_call.1
= control target key start
LH: loop header
LB: loop body
LE: loop exit
PB: predicated region body
PF: predicated region fallthrough
CT: control target
= control target key end

     0   :  { %16 = vsyncpa [#allocation3], 0  ;;  %s1685_s0 = inlined_call_operand.vmem [shape: f32[32,32], index: 0, kind: input, shape index: {}]   ;;  %s1686_s1 = inlined_call_operand.vmem [shape: bf16[32,64], index: 1, kind: input, shape index: {}]   ;;  %s1687_s2 = inlined_call_operand.vmem [shape: f32[32,32], index: 2, kind: input, shape index: {}]   ;;  %s1688_s3 = inlined_call_operand.vmem [shape: bf16[32,128], index: 3, kind: input, shape index: {}]   ;;  %s1689_s4 = inlined_call_operand.vmem [shape: bf16[128,32], index: 4, kind: input, shape index: {}]   ;;  %s1690_s5 = inlined_call_operand.hbm [shape: f32[8,32], index: 5, kind: input, shape index: {}]   ;;  %s1691_s6 = inlined_call_operand.vmem [shape: bf16[32,32], index: 6, kind: input, shape index: {}]   ;;  %s1692_s7 = inlined_call_operand.vmem [shape: bf16[48,32], index: 7, kind: input, shape index: {}]   ;;  %s1693_s8 = inlined_call_operand.hbm [shape: bf16[32,48], index: 8, kind: input, shape index: {}]   ;;  %s1694_s9 = inlined_call_operand.hbm [shape: f32[32,32], index: 9, kind: output, shape index: {0}]   ;;  %s1695_s10 = inlined_call_operand.hbm [shape: f32[1,32,32], index: 10, kind: output, shape index: {1}]  }
   0x1   :  { %17 = vsyncpa [#allocation6], 0 }
   0x2   :  { %18 = vsyncpa [#allocation4], 0 }
   0x3   :  { %19 = vsyncpa [#allocation9], 0  ;;  %s1394_s13 = smov [#allocation2]   ;;  %s1395_s15 = smov [#allocation5]  }
   0x4   :  { %s36_s14 = sshll.u32 %s1394_s13, 4  ;;  %s49_s16 = sshll.u32 %s1395_s15, 4  ;;  %s37_s14 = int_to_ptr.vmem [resolvable:$true] %s36_s14  ;;  %s50_s16 = int_to_ptr.vmem [resolvable:$true] %s49_s16 }
   0x5   :  { %s1314_s17 = scalar_lea.vmem %s37_s14, 128  ;;  %p1319_p1 = scmp.lt.s32.totalorder %s37_s14, %s37_s14 }
   0x6   :  { %p1315_p0 = scmp.ne.s32.totalorder %s37_s14, %s1314_s17  ;;  %p1320_p2 = scmp.lt.s32.totalorder %s1314_s17, %s1314_s17 }
   0x8   :  { %p1321_p3 = por %p1320_p2, %p1319_p1 }
   0xa   :  { %p1322_p4 = pnand %p1321_p3, %p1315_p0 }
   0xc   :  { %1325 = shalt.err (!%p1322_p4)
}
   0xd   :  { %39 = dma.hbm_to_vmem [thread:$0]  %s1690_s5, 128, %s37_s14, [#allocation3]  }
   0xe   :  { %s1334_s20 = scalar_lea.vmem %s50_s16, 256  ;;  %p1339_p6 = scmp.lt.s32.totalorder %s50_s16, %s50_s16 }
   0xf   :  { %p1335_p5 = scmp.ne.s32.totalorder %s50_s16, %s1334_s20  ;;  %p1340_p7 = scmp.lt.s32.totalorder %s1334_s20, %s1334_s20 }
  0x11   :  { %p1341_p8 = por %p1340_p7, %p1339_p6 }
  0x13   :  { %p1342_p9 = pnand %p1341_p8, %p1335_p5 }
  0x15   :  { %1345 = shalt.err (!%p1342_p9)
}
  0x16   :  { %s1396_s21 = smov 64   ;;  %s1397_s22 = smov 4  }
  0x17   :  { %55 = dma.hbm_to_vmem [thread:$0]  %s1693_s8, 256, %s50_s16, [#allocation6], %s1396_s21, %s1396_s21, %s1397_s22  }
  0x18   :  { %1386 = dma.done.wait [#allocation3], 128  }
  0x19   :  { %1387 = vsyncadd [#allocation3], 4294967168 }
  0x1a   :  { %1388 = dma.done.wait [#allocation6], 256  }
  0x1b   :  { %1389 = vsyncadd [#allocation6], 4294967040  ;;  %v1237_v0 = vld [vmem:[%s1686_s1 + $0x8] sm:$0xff]   ;;  %v1238_v1 = vld [vmem:[%s1686_s1] sm:$0xff]   ;;  %vm86_vm0 = vcmask 261120   ;;  %vm1400_vm1 = vmmov 0  }
  0x1c   :  { %1130 = vmatprep.subr.bf16.mxu0 %v1237_v0  ;;  %v1475_v2 = vld [vmem:[%s1685_s0] sm:$0xff]  ;;  %v1480_v3 = vld [vmem:[%s1685_s0 + $0x8] sm:$0xff]  ;;  %v1485_v4 = vld [vmem:[%s1685_s0 + $0x10] sm:$0xff]  ;;  %vm881_vm2 = vcmask 392192  }
  0x1d   :  { %1131 = vmatpush3.bf16.msra.mxu0 %v1237_v0  ;;  %v67_v5 = vpack.c.bf16 %v1480_v3, %v1475_v2  ;;  %v1492_v6 = vld [vmem:[%s1685_s0 + $0x18] sm:$0xff]  ;;  %v146_v16 = vld [vmem:[%s1687_s2 + $0x10] sm:$0xff]  ;;  %v144_v18 = vld [vmem:[%s1687_s2] sm:$0xff] }
  0x1e   :  { %1132 = vmatprep.subr.bf16.mxu0 %v1238_v1  ;;  %v68_v7 = vpack.c.bf16 %v1492_v6, %v1485_v4  ;;  %v147_v21 = vld [vmem:[%s1687_s2 + $0x18] sm:$0xff]  ;;  %v145_v25 = vld [vmem:[%s1687_s2 + $0x8] sm:$0xff]  ;;  %s1398_s2 = smov 96  }
  0x1f   :  { %1134 = vmatprep.mubr.msk.bf16.mxu0 %vm86_vm0, %v67_v5  ;;  %v88_v9 = vsel %vm86_vm0, %v67_v5, 0 }
  0x20   :  { %1224 = vmatprep.subr.msk.bf16.mxu1 %vm86_vm0, %v68_v7  ;;  %v91_v8 = vsel %vm86_vm0, %v68_v7, 0 }
  0x21   :  { %1133 = vmatpush3.bf16.msra.mxu0 %v1238_v1  ;;  %1139 = vmatpush3.bf16.xpose.msra.mxu1 %v91_v8 }
  0x22   :  { %1225 = vmatprep.subr.msk.bf16.mxu1 %vm86_vm0, %v67_v5 }
  0x24   :  { %1135 = vmatmul.mubr.msk.bf16.vlgmr.msra.gmra.mxu0 %vm86_vm0, %v68_v7 }
  0x29   :  { %1141 = vmatpush3.bf16.xpose.msra.mxu1 %v88_v9 }
  0xe4   :  { %v1136_v10 = vpop.f32.mrf.mxu0 }
  0xe6   :  { %v127_v11 = vpop.f32.mrf.mxu0 }
  0xe8   :  { %v1137_v12 = vpop.f32.mrf.mxu0 }
  0xe9   :  { %v143_v15 = vpack.c.bf16 %v1137_v12, %v1136_v10 }
  0xea   :  { %v130_v13 = vpop.f32.mrf.mxu0 }
  0xeb   :  { %v142_v14 = vpack.c.bf16 %v130_v13, %v127_v11 }
  0xed   :  { %1142 = vmatprep.mubr.msk.bf16.mxu1 %vm86_vm0, %v142_v14 }
  0xee   :  { %1143 = vmatmul.mubr.msk.bf16.vlgmr.msra.gmra.mxu1 %vm86_vm0, %v143_v15 }
 0x1ae   :  { %v1144_v17 = vpop.f32.mrf.mxu1 }
 0x1af   :  { %v197_v19 = vadd.f32 %v1144_v17, %v146_v16 }
 0x1b0   :  { %v188_v20 = vpop.f32.mrf.mxu1 }
 0x1b1   :  { %v189_v22 = vadd.f32 %v188_v20, %v144_v18  ;;  %v209_v23 = vsel %vm86_vm0, %v197_v19, -inf }
 0x1b2   :  { %210 = vmax.xlane.f32.xlu1 %v209_v23  ;;  %v1145_v24 = vpop.f32.mrf.mxu1 }
 0x1b3   :  { %v200_v26 = vadd.f32 %v1145_v24, %v147_v21  ;;  %v203_v27 = vsel %vm86_vm0, %v189_v22, -inf }
 0x1b4   :  { %v191_v28 = vpop.f32.mrf.mxu1  ;;  %204 = vmax.xlane.f32.xlu0 %v203_v27 }
 0x1b5   :  { %v192_v29 = vadd.f32 %v191_v28, %v145_v25  ;;  %v212_v30 = vsel %vm86_vm0, %v200_v26, -inf }
 0x1b6   :  { %213 = vmax.xlane.f32.xlu1 %v212_v30 }
 0x1b7   :  { %v206_v31 = vsel %vm86_vm0, %v192_v29, -inf }
 0x1b8   :  { %207 = vmax.xlane.f32.xlu0 %v206_v31 }
 0x23b   :  { %v211_v32 = vpop.xlane.xlu1 %210 }
 0x23c   :  { %v217_v33 = vsub.f32 %v197_v19, %v211_v32 }
 0x23d   :  { %v205_v34 = vpop.xlane.xlu0 %204 }
 0x23e   :  { %v223_v35 = vmul.f32 1.442695, %v217_v33  ;;  %v215_v36 = vsub.f32 %v189_v22, %v205_v34 }
 0x23f   :  { %v214_v37 = vpop.xlane.xlu1 %213 }
 0x240   :  { %1256 = vpow2.f32 %v223_v35  ;;  %v219_v38 = vmul.f32 1.442695, %v215_v36  ;;  %v218_v39 = vsub.f32 %v200_v26, %v214_v37  ;;  %v1545_v36 = vld [vmem:[%s1691_s6] sm:$0xff]  }
 0x241   :  { %v208_v40 = vpop.xlane.xlu0 %207 }
 0x242   :  { %1258 = vpow2.f32 %v219_v38  ;;  %v225_v41 = vmul.f32 1.442695, %v218_v39  ;;  %v216_v42 = vsub.f32 %v192_v29, %v208_v40 }
 0x244   :  { %1260 = vpow2.f32 %v225_v41  ;;  %v221_v43 = vmul.f32 1.442695, %v216_v42 }
 0x246   :  { %1262 = vpow2.f32 %v221_v43  ;;  %v373_v43 = vlaneseq }
 0x24d   :  { %v1257_v44 = vpop.eup %1256 }
 0x24e   :  { %v233_v45 = vsel %vm86_vm0, %v1257_v44, 0.0 }
 0x24f   :  { %v1259_v46 = vpop.eup %1258  ;;  %234 = vadd.xlane.f32.xlu0 %v233_v45 }
 0x250   :  { %v227_v49 = vsel %vm86_vm0, %v1259_v46, 0.0 }
 0x251   :  { %v1261_v47 = vpop.eup %1260 }
 0x252   :  { %v236_v48 = vsel %vm86_vm0, %v1261_v47, 0.0 }
 0x253   :  { %v1263_v50 = vpop.eup %1262  ;;  %237 = vadd.xlane.f32.xlu1 %v236_v48  ;;  %228 = vadd.xlane.f32.xlu0 %v227_v49 }
 0x254   :  { %v230_v51 = vsel %vm86_vm0, %v1263_v50, 0.0 }
 0x257   :  { %231 = vadd.xlane.f32.xlu1 %v230_v51 }
 0x268   :  { %255 = vrot.lane.b32.xlu1 %v142_v14, %s1398_s2 }
 0x269   :  { %257 = vrot.lane.b32.xlu0 %v143_v15, %s1398_s2 }
 0x2d8   :  { %v235_v52 = vpop.xlane.xlu0 %234 }
 0x2d9   :  { %1264 = vrcp.f32 %v235_v52  ;;  %v1552_v52 = vld [vmem:[#allocation2] sm:$0xff] }
 0x2dc   :  { %v238_v53 = vpop.xlane.xlu1 %237  ;;  %v229_v54 = vpop.xlane.xlu0 %228 }
 0x2dd   :  { %1266 = vrcp.f32 %v238_v53 }
 0x2de   :  { %1268 = vrcp.f32 %v229_v54 }
 0x2e0   :  { %v232_v55 = vpop.xlane.xlu1 %231  ;;  %v258_v56 = vpop.permute.xlu0 %257 }
 0x2e1   :  { %1270 = vrcp.f32 %v232_v55  ;;  %1146 = vmatprep.subr.bf16.mxu0 %v258_v56 }
 0x2e2   :  { %1147 = vmatpush3.bf16.msra.mxu0 %v258_v56 }
 0x2e4   :  { %v256_v57 = vpop.permute.xlu1 %255 }
 0x2e5   :  { %1148 = vmatprep.subr.bf16.mxu0 %v256_v57 }
 0x2e6   :  { %v1265_v58 = vpop.eup %1264  ;;  %1149 = vmatpush3.bf16.msra.mxu0 %v256_v57 }
 0x2e7   :  { %v245_v59 = vmul.f32 %v1265_v58, %v1257_v44 }
 0x2e9   :  { %249 = vst.msk [vmem:[#allocation8 + $0x10] sm:$0xff] %vm86_vm0, %v245_v59 }
 0x2ea   :  { %v1267_v60 = vpop.eup %1266 }
 0x2eb   :  { %v1269_v61 = vpop.eup %1268  ;;  %v246_v62 = vmul.f32 %v1267_v60, %v1261_v47 }
 0x2ec   :  { %v243_v63 = vmul.f32 %v1269_v61, %v1259_v46 }
 0x2ed   :  { %250 = vst.msk [vmem:[#allocation8 + $0x18] sm:$0xff] %vm86_vm0, %v246_v62  ;;  %v252_v7 = vpack.c.bf16 %v246_v62, %v245_v59 }
 0x2ee   :  { %v1271_v0 = vpop.eup %1270  ;;  %247 = vst.msk [vmem:[#allocation8] sm:$0xff] %vm86_vm0, %v243_v63 }
 0x2ef   :  { %v244_v1 = vmul.f32 %v1271_v0, %v1263_v50  ;;  %v1549_v50 = vshrl.u32 %v373_v43, 7 }
 0x2f1   :  { %248 = vst.msk [vmem:[#allocation8 + $0x8] sm:$0xff] %vm86_vm0, %v244_v1  ;;  %v251_v5 = vpack.c.bf16 %v244_v1, %v243_v63  ;;  %v375_v51 = vsub.s32 0, %v1549_v50  ;;  %v383_v56 = vsub.s32 1, %v1549_v50 }
 0x2f3   :  { %1150 = vmatprep.mubr.msk.bf16.mxu0 %vm86_vm0, %v251_v5  ;;  %v376_v55 = vrot.slane %v1552_v52, %v375_v51  ;;  %v384_v60 = vrot.slane %v1552_v52, %v383_v56  ;;  %v1251_v56 = vld [vmem:[%s1692_s7] sm:$0xff]  }
 0x2f4   :  { %1151 = vmatmul.mubr.msk.bf16.vlgmr.msra.gmra.mxu0 %vm86_vm0, %v252_v7 }
 0x2f5   :  { %1158 = vmatprep.mubr.msk.bf16.mxu0 %vm86_vm0, %v1545_v36 }
 0x3b4   :  { %v1152_v8 = vpop.f32.mrf.mxu0 }
 0x3b5   :  { %v318_v9 = vadd.f32 %v1152_v8, %v1485_v4 }
 0x3b6   :  { %v301_v10 = vpop.f32.mrf.mxu0 }
 0x3b7   :  { %v326_v11 = vsel %vm86_vm0, %v318_v9, 0.0  ;;  %v316_v15 = vadd.f32 %v301_v10, %v1475_v2 }
 0x3b8   :  { %327 = vadd.xlane.f32.xlu1 %v326_v11  ;;  %v1153_v12 = vpop.f32.mrf.mxu0 }
 0x3b9   :  { %v319_v13 = vadd.f32 %v1153_v12, %v1492_v6  ;;  %v320_v4 = vsel %vm86_vm0, %v316_v15, 0.0 }
 0x3ba   :  { %v304_v14 = vpop.f32.mrf.mxu0 }
 0x3bb   :  { %v317_v16 = vadd.f32 %v304_v14, %v1480_v3  ;;  %v329_v17 = vsel %vm86_vm0, %v319_v13, 0.0  ;;  %v1560_v14 = vld [vmem:[%s1691_s6 + $0x8] sm:$0xff]  }
 0x3bc   :  { %330 = vadd.xlane.f32.xlu0 %v329_v17  ;;  %v1243_v17 = vld [vmem:[%s1689_s4 + $0x38] sm:$0xff]  }
 0x3bd   :  { %v323_v18 = vsel %vm86_vm0, %v317_v16, 0.0 }
 0x3be   :  { %324 = vadd.xlane.f32.xlu1 %v323_v18  ;;  %v1244_v18 = vld [vmem:[%s1689_s4 + $0x30] sm:$0xff]  }
 0x3c0   :  { %321 = vadd.xlane.f32.xlu0 %v320_v4  ;;  %v1245_v4 = vld [vmem:[%s1689_s4 + $0x28] sm:$0xff]  }
 0x441   :  { %v328_v19 = vpop.xlane.xlu1 %327 }
 0x442   :  { %v335_v20 = vmul.f32 0.03125, %v328_v19  ;;  %v1246_v19 = vld [vmem:[%s1689_s4 + $0x20] sm:$0xff]  }
 0x444   :  { %v339_v21 = vsub.f32 %v318_v9, %v335_v20  ;;  %v1247_v20 = vld [vmem:[%s1689_s4 + $0x18] sm:$0xff]  }
 0x445   :  { %v331_v22 = vpop.xlane.xlu0 %330 }
 0x446   :  { %v336_v23 = vmul.f32 0.03125, %v331_v22  ;;  %v343_v6 = vmul.f32 %v339_v21, %v339_v21 }
 0x447   :  { %v325_v24 = vpop.xlane.xlu1 %324 }
 0x448   :  { %v340_v25 = vsub.f32 %v319_v13, %v336_v23  ;;  %v334_v2 = vmul.f32 0.03125, %v325_v24  ;;  %v351_v3 = vsel %vm86_vm0, %v343_v6, 0.0 }
 0x449   :  { %352 = vadd.xlane.f32.xlu0 %v351_v3  ;;  %v322_v26 = vpop.xlane.xlu0 %321  ;;  %v1249_v3 = vld [vmem:[%s1689_s4 + $0x8] sm:$0xff]  }
 0x44a   :  { %v338_v27 = vsub.f32 %v317_v16, %v334_v2  ;;  %v333_v28 = vmul.f32 0.03125, %v322_v26  ;;  %v344_v29 = vmul.f32 %v340_v25, %v340_v25  ;;  %v1242_v16 = vld [vmem:[%s1688_s3] sm:$0xff]   ;;  %v1248_v2 = vld [vmem:[%s1689_s4 + $0x10] sm:$0xff]  }
 0x44b   :  { %v1250_v26 = vld [vmem:[%s1689_s4] sm:$0xff]  }
 0x44c   :  { %v337_v30 = vsub.f32 %v316_v15, %v333_v28  ;;  %v354_v31 = vsel %vm86_vm0, %v344_v29, 0.0  ;;  %v342_v32 = vmul.f32 %v338_v27, %v338_v27  ;;  %v1241_v15 = vld [vmem:[%s1688_s3 + $0x8] sm:$0xff]  }
 0x44d   :  { %355 = vadd.xlane.f32.xlu1 %v354_v31  ;;  %1162 = vmatprep.subr.bf16.mxu1 %v1241_v15 }
 0x44e   :  { %v341_v33 = vmul.f32 %v337_v30, %v337_v30  ;;  %v348_v35 = vsel %vm86_vm0, %v342_v32, 0.0  ;;  %1163 = vmatpush3.bf16.msra.mxu1 %v1241_v15 }
 0x44f   :  { %1164 = vmatprep.subr.bf16.mxu1 %v1242_v16 }
 0x450   :  { %v345_v34 = vsel %vm86_vm0, %v341_v33, 0.0 }
 0x451   :  { %346 = vadd.xlane.f32.xlu0 %v345_v34  ;;  %349 = vadd.xlane.f32.xlu1 %v348_v35 }
 0x452   :  { %1165 = vmatpush3.bf16.msra.mxu1 %v1242_v16 }
 0x4d2   :  { %v353_v37 = vpop.xlane.xlu0 %352 }
 0x4d3   :  { %v359_v38 = vmul.f32 0.03125, %v353_v37 }
 0x4d5   :  { %v363_v39 = vadd.f32 1e-05, %v359_v38 }
 0x4d6   :  { %v356_v40 = vpop.xlane.xlu1 %355 }
 0x4d7   :  { %1272 = vrsqrt.f32 %v363_v39  ;;  %v360_v41 = vmul.f32 0.03125, %v356_v40 }
 0x4d9   :  { %v364_v42 = vadd.f32 1e-05, %v360_v41 }
 0x4da   :  { %v347_v44 = vpop.xlane.xlu0 %346  ;;  %v350_v45 = vpop.xlane.xlu1 %349 }
 0x4db   :  { %1274 = vrsqrt.f32 %v364_v42  ;;  %v357_v46 = vmul.f32 0.03125, %v347_v44  ;;  %v358_v47 = vmul.f32 0.03125, %v350_v45 }
 0x4dd   :  { %v361_v48 = vadd.f32 1e-05, %v357_v46  ;;  %v362_v49 = vadd.f32 1e-05, %v358_v47  ;;  %v1399_v47 = vmov 0.0  }
 0x4df   :  { %1276 = vrsqrt.f32 %v361_v48 }
 0x4e0   :  { %1278 = vrsqrt.f32 %v362_v49 }
 0x4e4   :  { %v1273_v53 = vpop.eup %1272 }
 0x4e5   :  { %v371_v54 = vmul.f32 %v1273_v53, %v339_v21 }
 0x4e7   :  { %v379_v59 = vmul.f32 %v376_v55, %v371_v54 }
 0x4e8   :  { %v1275_v57 = vpop.eup %1274 }
 0x4e9   :  { %v372_v58 = vmul.f32 %v1275_v57, %v340_v25  ;;  %v387_v0 = vadd.f32 %v384_v60, %v379_v59  ;;  %v1252_v57 = vld [vmem:[%s1692_s7 + $0x8] sm:$0xff]  }
 0x4ea   :  { %v1254_v59 = vld [vmem:[#allocation5] sm:$0xff]  }
 0x4eb   :  { %v380_v61 = vmul.f32 %v376_v55, %v372_v58  ;;  %v1253_v58 = vld [vmem:[%s1692_s7 + $0x10] sm:$0xff]   ;;  %s1401_s7 = smov [#allocation8]  }
 0x4ec   :  { %v1277_v62 = vpop.eup %1276  ;;  %s1030_s23 = sshll.u32 %s1401_s7, 4  ;;  %s1031_s23 = int_to_ptr.vmem [resolvable:$true] %s1030_s23 }
 0x4ed   :  { %v1279_v63 = vpop.eup %1278  ;;  %v388_v1 = vadd.f32 %v384_v60, %v380_v61  ;;  %v369_v5 = vmul.f32 %v1277_v62, %v337_v30  ;;  %s1346_s24 = scalar_lea.vmem %s1031_s23, 512  ;;  %p1351_p11 = scmp.lt.s32.totalorder %s1031_s23, %s1031_s23 }
 0x4ee   :  { %v370_v7 = vmul.f32 %v1279_v63, %v338_v27  ;;  %p1347_p10 = scmp.ne.s32.totalorder %s1031_s23, %s1346_s24  ;;  %p1352_p12 = scmp.lt.s32.totalorder %s1346_s24, %s1346_s24 }
 0x4ef   :  { %v394_v8 = vpack.c.bf16 %v388_v1, %v387_v0  ;;  %v377_v9 = vmul.f32 %v376_v55, %v369_v5 }
 0x4f0   :  { %v378_v10 = vmul.f32 %v376_v55, %v370_v7  ;;  %p1353_p13 = por %p1352_p12, %p1351_p11 }
 0x4f1   :  { %1154 = vmatprep.subr.bf16.mxu0 %v394_v8  ;;  %v385_v11 = vadd.f32 %v384_v60, %v377_v9 }
 0x4f2   :  { %1155 = vmatpush3.bf16.msra.mxu0 %v394_v8  ;;  %v386_v12 = vadd.f32 %v384_v60, %v378_v10  ;;  %p1354_p0 = pnand %p1353_p13, %p1347_p10 }
 0x4f4   :  { %v393_v13 = vpack.c.bf16 %v386_v12, %v385_v11 }
 0x4f6   :  { %1156 = vmatprep.subr.bf16.mxu0 %v393_v13 }
 0x4f7   :  { %1157 = vmatpush3.bf16.msra.mxu0 %v393_v13 }
 0x4f8   :  { %1170 = vmatprep.subr.bf16.mxu0 %v1243_v17 }
 0x4fa   :  { %1159 = vmatmul.mubr.msk.bf16.vlgmr.msra.gmra.mxu0 %vm86_vm0, %v1560_v14 }
 0x4fb   :  { %1171 = vmatpush3.bf16.msra.mxu0 %v1243_v17 }
 0x4fc   :  { %1172 = vmatprep.subr.bf16.mxu0 %v1244_v18 }
 0x4ff   :  { %1173 = vmatpush3.bf16.msra.mxu0 %v1244_v18 }
 0x500   :  { %1174 = vmatprep.subr.bf16.mxu0 %v1245_v4 }
 0x503   :  { %1175 = vmatpush3.bf16.msra.mxu0 %v1245_v4 }
 0x504   :  { %1176 = vmatprep.subr.bf16.mxu0 %v1246_v19 }
 0x507   :  { %1177 = vmatpush3.bf16.msra.mxu0 %v1246_v19 }
 0x508   :  { %1178 = vmatprep.subr.bf16.mxu0 %v1247_v20 }
 0x50b   :  { %1179 = vmatpush3.bf16.msra.mxu0 %v1247_v20  ;;  %v828_v20 = vsub.s32 4, %v1549_v50 }
 0x50c   :  { %1180 = vmatprep.subr.bf16.mxu0 %v1248_v2 }
 0x50f   :  { %1181 = vmatpush3.bf16.msra.mxu0 %v1248_v2 }
 0x510   :  { %1182 = vmatprep.subr.bf16.mxu0 %v1249_v3 }
 0x513   :  { %1183 = vmatpush3.bf16.msra.mxu0 %v1249_v3 }
 0x514   :  { %1184 = vmatprep.subr.bf16.mxu0 %v1250_v26 }
 0x517   :  { %1185 = vmatpush3.bf16.msra.mxu0 %v1250_v26 }
 0x5ba   :  { %v1160_v21 = vpop.f32.mrf.mxu0 }
 0x5bc   :  { %v445_v22 = vpop.f32.mrf.mxu0 }
 0x5be   :  { %v1161_v23 = vpop.f32.mrf.mxu0 }
 0x5bf   :  { %v461_v25 = vpack.c.bf16 %v1161_v23, %v1160_v21 }
 0x5c0   :  { %v448_v6 = vpop.f32.mrf.mxu0 }
 0x5c1   :  { %v460_v24 = vpack.c.bf16 %v448_v6, %v445_v22 }
 0x5c3   :  { %1166 = vmatprep.mubr.msk.bf16.mxu1 %vm86_vm0, %v460_v24 }
 0x5c4   :  { %1167 = vmatmul.mubr.msk.bf16.vlgmr.msra.gmra.mxu1 %vm86_vm0, %v461_v25 }
 0x5c5   :  { %1194 = vmatprep.mubr.msk.bf16.mxu1 %vm86_vm0, %v1545_v36 }
 0x684   :  { %v1168_v27 = vpop.f32.mrf.mxu1 }
 0x685   :  { %v535_v34 = vmax.f32 %v1168_v27, 0.0 }
 0x686   :  { %v518_v28 = vpop.f32.mrf.mxu1 }
 0x687   :  { %v533_v32 = vmax.f32 %v518_v28, 0.0 }
 0x688   :  { %v1169_v29 = vpop.f32.mrf.mxu1 }
 0x689   :  { %v536_v30 = vmax.f32 %v1169_v29, 0.0 }
 0x68a   :  { %v521_v31 = vpop.f32.mrf.mxu1 }
 0x68b   :  { %v534_v33 = vmax.f32 %v521_v31, 0.0  ;;  %v538_v36 = vpack.c.bf16 %v536_v30, %v535_v34 }
 0x68d   :  { %v537_v35 = vpack.c.bf16 %v534_v33, %v533_v32 }
 0x68f   :  { %1186 = vmatprep.mubr.bf16.mxu0 %v537_v35 }
 0x690   :  { %1187 = vmatmul.mubr.bf16.vlgmr.msra.gmra.mxu0 %v538_v36 }
 0x750   :  { %v1188_v37 = vpop.f32.mrf.mxu0 }
 0x751   :  { %v654_v40 = vadd.f32 %v1188_v37, %v1160_v21  ;;  %v835_v21 = vsub.s32 5, %v1549_v50 }
 0x752   :  { %v637_v38 = vpop.f32.mrf.mxu0 }
 0x753   :  { %v652_v43 = vadd.f32 %v637_v38, %v445_v22  ;;  %v836_v2 = vrot.slane %v1552_v52, %v835_v21 }
 0x754   :  { %v1189_v39 = vpop.f32.mrf.mxu0 }
 0x755   :  { %v655_v41 = vadd.f32 %v1189_v39, %v1161_v23 }
 0x756   :  { %v640_v42 = vpop.f32.mrf.mxu0 }
 0x757   :  { %v657_v44 = vpack.c.bf16 %v655_v41, %v654_v40  ;;  %v653_v45 = vadd.f32 %v640_v42, %v448_v6  ;;  %v829_v6 = vrot.slane %v1552_v52, %v828_v20 }
 0x759   :  { %v656_v46 = vpack.c.bf16 %v653_v45, %v652_v43  ;;  %1190 = vmatprep.subr.bf16.mxu1 %v657_v44 }
 0x75a   :  { %1191 = vmatpush3.bf16.msra.mxu1 %v657_v44 }
 0x75b   :  { %1192 = vmatprep.subr.bf16.mxu1 %v656_v46 }
 0x75e   :  { %1193 = vmatpush3.bf16.msra.mxu1 %v656_v46 }
 0x75f   :  { %1198 = vmatprep.subr.bf16.mxu1 %v1399_v47 }
 0x761   :  { %1195 = vmatmul.mubr.msk.bf16.vlgmr.msra.gmra.mxu1 %vm86_vm0, %v1560_v14 }
 0x762   :  { %1202 = vmatprep.mubr.msk.bf16.mxu1 %vm1400_vm1, %v1399_v47 }
 0x821   :  { %v1601_v48 = vpop.f32.mrf.mxu1 }
 0x823   :  { %v1603_v49 = vpop.f32.mrf.mxu1 }
 0x825   :  { %v1605_v51 = vpop.f32.mrf.mxu1 }
 0x826   :  { %v714_v53 = vpack.c.bf16 %v1605_v51, %v1601_v48 }
 0x827   :  { %v1609_v54 = vpop.f32.mrf.mxu1 }
 0x828   :  { %1199 = vmatpush3.bf16.msra.mxu1 %v714_v53  ;;  %v713_v55 = vpack.c.bf16 %v1609_v54, %v1603_v49 }
 0x829   :  { %1200 = vmatprep.subr.bf16.mxu1 %v1399_v47 }
 0x82c   :  { %1201 = vmatpush3.bf16.msra.mxu1 %v713_v55 }
 0x82f   :  { %1203 = vmatmul.mubr.msk.bf16.vlgmr.msra.gmra.mxu1 %vm86_vm0, %v1251_v56 }
 0x830   :  { %1206 = vmatprep.mubr.msk.bf16.mxu1 %vm1400_vm1, %v1399_v47 }
 0x837   :  { %1207 = vmatmul.mubr.msk.bf16.gmra.mxu1 %vm86_vm0, %v1252_v57 }
 0x838   :  { %1210 = vmatprep.mubr.msk.bf16.mxu1 %vm1400_vm1, %v1399_v47 }
 0x83f   :  { %1211 = vmatmul.mubr.msk.bf16.gmra.mxu1 %vm86_vm0, %v1253_v58 }
 0x840   :  { %1220 = vmatprep.mubr.msk.bf16.mxu1 %vm881_vm2, %v1254_v59 }
 0x8ef   :  { %v1628_v60 = vpop.f32.mrf.mxu1 }
 0x8f0   :  { %v796_v7 = vmul.f32 %v1628_v60, %v1628_v60 }
 0x8f1   :  { %v1204_v61 = vpop.f32.mrf.mxu1 }
 0x8f3   :  { %v1630_v62 = vpop.f32.mrf.mxu1 }
 0x8f4   :  { %v797_v12 = vmul.f32 %v1630_v62, %v1630_v62 }
 0x8f5   :  { %v1205_v63 = vpop.f32.mrf.mxu1 }
 0x8f7   :  { %v1632_v0 = vpop.f32.mrf.mxu1 }
 0x8f8   :  { %v798_v17 = vmul.f32 %v1632_v0, %v1632_v0 }
 0x8f9   :  { %v1208_v1 = vpop.f32.mrf.mxu1 }
 0x8fb   :  { %v1634_v5 = vpop.f32.mrf.mxu1 }
 0x8fc   :  { %v799_v8 = vmul.f32 %v1634_v5, %v1634_v5 }
 0x8fd   :  { %v1209_v9 = vpop.f32.mrf.mxu1 }
 0x8fe   :  { %v802_v10 = vadd.f32 %v799_v8, %v796_v7 }
 0x8ff   :  { %v789_v11 = vpop.f32.mrf.mxu1 }
 0x900   :  { %1280 = vrsqrt.f32 %v802_v10  ;;  %v800_v13 = vmul.f32 %v789_v11, %v789_v11  ;;  %vm807_vm3 = vcmp.eq.f32.partialorder %v802_v10, inf  ;;  %v810_v24 = vand.u32 2147483648, %v802_v10 }
 0x901   :  { %v1212_v14 = vpop.f32.mrf.mxu1  ;;  %vm809_vm4 = vcmp.eq.f32.partialorder %v802_v10, 0.0 }
 0x902   :  { %v803_v15 = vadd.f32 %v800_v13, %v797_v12  ;;  %v1255_v14 = vld [vmem:[#allocation5 + $0x8] sm:$0xff]  }
 0x903   :  { %v792_v16 = vpop.f32.mrf.mxu1 }
 0x904   :  { %v801_v18 = vmul.f32 %v792_v16, %v792_v16  ;;  %1282 = vrsqrt.f32 %v803_v15  ;;  %vm814_vm5 = vcmp.eq.f32.partialorder %v803_v15, inf  ;;  %v817_v30 = vand.u32 2147483648, %v803_v15 }
 0x905   :  { %v1213_v4 = vpop.f32.mrf.mxu1  ;;  %vm816_vm6 = vcmp.eq.f32.partialorder %v803_v15, 0.0 }
 0x906   :  { %v804_v19 = vadd.f32 %v801_v18, %v798_v17 }
 0x908   :  { %1284 = vrsqrt.f32 %v804_v19  ;;  %vm821_vm7 = vcmp.eq.f32.partialorder %v804_v19, inf  ;;  %v824_v37 = vand.u32 2147483648, %v804_v19  ;;  %vm823_vm8 = vcmp.eq.f32.partialorder %v804_v19, 0.0 }
 0x90d   :  { %v1281_v22 = vpop.eup %1280 }
 0x90e   :  { %v806_v23 = vmul.f32 %v1281_v22, %v802_v10 }
 0x910   :  { %v808_v25 = vsel %vm807_vm3, %v802_v10, %v806_v23 }
 0x911   :  { %v811_v3 = vsel %vm809_vm4, %v810_v24, %v808_v25  ;;  %v1283_v26 = vpop.eup %1282 }
 0x912   :  { %v830_v27 = vmul.f32 %v829_v6, %v811_v3  ;;  %v813_v28 = vmul.f32 %v1283_v26, %v803_v15 }
 0x914   :  { %v837_v29 = vadd.f32 %v836_v2, %v830_v27  ;;  %v815_v32 = vsel %vm814_vm5, %v803_v15, %v813_v28 }
 0x915   :  { %v1285_v31 = vpop.eup %1284  ;;  %v818_v33 = vsel %vm816_vm6, %v817_v30, %v815_v32 }
 0x916   :  { %v820_v34 = vmul.f32 %v1285_v31, %v804_v19  ;;  %v1079_v35 = vmul.f32 -1.442695, %v837_v29  ;;  %v831_v36 = vmul.f32 %v829_v6, %v818_v33 }
 0x918   :  { %v822_v38 = vsel %vm821_vm7, %v804_v19, %v820_v34  ;;  %v838_v39 = vadd.f32 %v836_v2, %v831_v36  ;;  %1286 = vpow2.f32 %v1079_v35 }
 0x919   :  { %v825_v40 = vsel %vm823_vm8, %v824_v37, %v822_v38 }
 0x91a   :  { %v832_v41 = vmul.f32 %v829_v6, %v825_v40  ;;  %v1080_v42 = vmul.f32 -1.442695, %v838_v39 }
 0x91c   :  { %v839_v43 = vadd.f32 %v836_v2, %v832_v41  ;;  %1288 = vpow2.f32 %v1080_v42 }
 0x91e   :  { %v1081_v44 = vmul.f32 -1.442695, %v839_v43 }
 0x920   :  { %1290 = vpow2.f32 %v1081_v44 }
 0x925   :  { %v1287_v45 = vpop.eup %1286 }
 0x926   :  { %v849_v47 = vadd.f32 1.0, %v1287_v45 }
 0x929   :  { %v1289_v46 = vpop.eup %1288 }
 0x92a   :  { %v850_v53 = vadd.f32 1.0, %v1289_v46 }
 0x92c   :  { %1292 = vrcp.f32 %v850_v53 }
 0x92d   :  { %v1291_v55 = vpop.eup %1290  ;;  %1294 = vrcp.f32 %v849_v47 }
 0x92e   :  { %v851_v56 = vadd.f32 1.0, %v1291_v55 }
 0x930   :  { %1296 = vrcp.f32 %v851_v56 }
 0x939   :  { %v1293_v57 = vpop.eup %1292 }
 0x93a   :  { %v1295_v58 = vpop.eup %1294  ;;  %v862_v61 = vmul.f32 %v1293_v57, %v789_v11  ;;  %v859_v10 = vmul.f32 %v1293_v57, %v1630_v62 }
 0x93b   :  { %v861_v7 = vmul.f32 %v1295_v58, %v1634_v5  ;;  %v858_v12 = vmul.f32 %v1295_v58, %v1628_v60 }
 0x93d   :  { %v1297_v59 = vpop.eup %1296  ;;  %v868_v13 = vpack.c.bf16 %v859_v10, %v858_v12 }
 0x93e   :  { %v863_v63 = vmul.f32 %v1297_v59, %v792_v16  ;;  %v860_v1 = vmul.f32 %v1297_v59, %v1632_v0 }
 0x940   :  { %v870_v8 = vpack.c.bf16 %v863_v63, %v862_v61  ;;  %v869_v9 = vpack.c.bf16 %v861_v7, %v860_v1 }
 0x942   :  { %1214 = vmatprep.subr.bf16.mxu1 %v870_v8 }
 0x943   :  { %1215 = vmatpush3.bf16.msra.mxu1 %v870_v8 }
 0x944   :  { %1216 = vmatprep.subr.bf16.mxu1 %v869_v9 }
 0x947   :  { %1217 = vmatpush3.bf16.msra.mxu1 %v869_v9 }
 0x948   :  { %1218 = vmatprep.subr.bf16.mxu1 %v868_v13 }
 0x94b   :  { %1219 = vmatpush3.bf16.msra.mxu1 %v868_v13 }
 0x94e   :  { %1221 = vmatmul.mubr.msk.bf16.vlgmr.msra.gmra.mxu1 %vm881_vm2, %v1255_v14 }
 0xa0e   :  { %v1222_v11 = vpop.f32.mrf.mxu1 }
 0xa0f   :  { %v939_v16 = vadd.f32 %v1222_v11, %v1601_v48 }
 0xa10   :  { %v922_v0 = vpop.f32.mrf.mxu1 }
 0xa11   :  { %v937_v5 = vadd.f32 %v922_v0, %v1603_v49  ;;  %v947_v4 = vsel %vm86_vm0, %v939_v16, 0.0 }
 0xa12   :  { %v1223_v15 = vpop.f32.mrf.mxu1 }
 0xa13   :  { %v941_v62 = vsel %vm86_vm0, %v937_v5, 0.0  ;;  %v940_v18 = vadd.f32 %v1223_v15, %v1605_v51 }
 0xa14   :  { %942 = vadd.xlane.f32.xlu0 %v941_v62  ;;  %v925_v17 = vpop.f32.mrf.mxu1 }
 0xa15   :  { %v938_v60 = vadd.f32 %v925_v17, %v1609_v54  ;;  %v950_v20 = vsel %vm86_vm0, %v940_v18, 0.0 }
 0xa17   :  { %v944_v19 = vsel %vm86_vm0, %v938_v60, 0.0 }
 0xa18   :  { %948 = vadd.xlane.f32.xlu0 %v947_v4  ;;  %945 = vadd.xlane.f32.xlu1 %v944_v19 }
 0xa1c   :  { %951 = vadd.xlane.f32.xlu1 %v950_v20 }
 0xa9d   :  { %v943_v49 = vpop.xlane.xlu0 %942 }
 0xa9e   :  { %v953_v21 = vmul.f32 0.03125, %v943_v49 }
 0xaa0   :  { %v957_v48 = vsub.f32 %v937_v5, %v953_v21 }
 0xaa1   :  { %v949_v22 = vpop.xlane.xlu0 %948  ;;  %v946_v23 = vpop.xlane.xlu1 %945 }
 0xaa2   :  { %v955_v6 = vmul.f32 0.03125, %v949_v22  ;;  %v954_v24 = vmul.f32 0.03125, %v946_v23  ;;  %v961_v25 = vmul.f32 %v957_v48, %v957_v48 }
 0xaa4   :  { %v959_v54 = vsub.f32 %v939_v16, %v955_v6  ;;  %v958_v2 = vsub.f32 %v938_v60, %v954_v24  ;;  %v965_v51 = vsel %vm86_vm0, %v961_v25, 0.0 }
 0xaa5   :  { %966 = vadd.xlane.f32.xlu0 %v965_v51  ;;  %v952_v3 = vpop.xlane.xlu1 %951 }
 0xaa6   :  { %v956_v26 = vmul.f32 0.03125, %v952_v3  ;;  %v963_v27 = vmul.f32 %v959_v54, %v959_v54  ;;  %v962_v28 = vmul.f32 %v958_v2, %v958_v2 }
 0xaa8   :  { %v960_v29 = vsub.f32 %v940_v18, %v956_v26  ;;  %v971_v30 = vsel %vm86_vm0, %v963_v27, 0.0  ;;  %v968_v31 = vsel %vm86_vm0, %v962_v28, 0.0 }
 0xaa9   :  { %972 = vadd.xlane.f32.xlu0 %v971_v30  ;;  %969 = vadd.xlane.f32.xlu1 %v968_v31 }
 0xaaa   :  { %v964_v32 = vmul.f32 %v960_v29, %v960_v29 }
 0xaac   :  { %v974_v33 = vsel %vm86_vm0, %v964_v32, 0.0 }
 0xaad   :  { %975 = vadd.xlane.f32.xlu1 %v974_v33 }
 0xaae   :  { %1357 = shalt.err (!%p1354_p0)
}
 0xaaf   :  { %s1402_s25 = smov 128   ;;  %s1403_s26 = smov 8   ;;  %v995_v46 = vsub.s32 2, %v1549_v50  ;;  %v1003_v47 = vsub.s32 3, %v1549_v50 }
 0xab0   :  { %1036 = dma.vmem_to_hbm [thread:$0]  %s1031_s23, 512, %s1695_s10, [#allocation9], %s1402_s25, %s1402_s25, %s1403_s26  }
 0xab1   :  { %v996_v53 = vrot.slane %v1552_v52, %v995_v46  ;;  %v1004_v56 = vrot.slane %v1552_v52, %v1003_v47  ;;  %s1404_s10 = smov [#allocation7]  }
 0xab2   :  { %s1018_s28 = sshll.u32 %s1404_s10, 4  ;;  %s1019_s28 = int_to_ptr.vmem [resolvable:$true] %s1018_s28 }
 0xab3   :  { %s1366_s29 = scalar_lea.vmem %s1019_s28, 512  ;;  %p1371_p2 = scmp.lt.s32.totalorder %s1019_s28, %s1019_s28 }
 0xab4   :  { %p1367_p1 = scmp.ne.s32.totalorder %s1019_s28, %s1366_s29  ;;  %p1372_p3 = scmp.lt.s32.totalorder %s1366_s29, %s1366_s29 }
 0xab6   :  { %p1373_p4 = por %p1372_p3, %p1371_p2 }
 0xab8   :  { %p1374_p5 = pnand %p1373_p4, %p1367_p1 }
 0xb2e   :  { %v967_v34 = vpop.xlane.xlu0 %966 }
 0xb2f   :  { %v977_v35 = vmul.f32 0.03125, %v967_v34 }
 0xb31   :  { %v981_v36 = vadd.f32 1e-05, %v977_v35 }
 0xb32   :  { %v973_v37 = vpop.xlane.xlu0 %972  ;;  %v970_v38 = vpop.xlane.xlu1 %969 }
 0xb33   :  { %1298 = vrsqrt.f32 %v981_v36  ;;  %v979_v39 = vmul.f32 0.03125, %v973_v37  ;;  %v978_v40 = vmul.f32 0.03125, %v970_v38 }
 0xb35   :  { %v983_v41 = vadd.f32 1e-05, %v979_v39  ;;  %v982_v42 = vadd.f32 1e-05, %v978_v40 }
 0xb36   :  { %v976_v43 = vpop.xlane.xlu1 %975 }
 0xb37   :  { %1300 = vrsqrt.f32 %v983_v41  ;;  %v980_v44 = vmul.f32 0.03125, %v976_v43 }
 0xb38   :  { %1302 = vrsqrt.f32 %v982_v42 }
 0xb39   :  { %v984_v45 = vadd.f32 1e-05, %v980_v44 }
 0xb3b   :  { %1304 = vrsqrt.f32 %v984_v45 }
 0xb40   :  { %v1299_v55 = vpop.eup %1298 }
 0xb41   :  { %v989_v57 = vmul.f32 %v1299_v55, %v957_v48 }
 0xb43   :  { %v997_v58 = vmul.f32 %v996_v53, %v989_v57 }
 0xb44   :  { %v1301_v59 = vpop.eup %1300 }
 0xb45   :  { %v1303_v61 = vpop.eup %1302  ;;  %v1005_v63 = vadd.f32 %v1004_v56, %v997_v58  ;;  %v991_v1 = vmul.f32 %v1301_v59, %v959_v54 }
 0xb46   :  { %v990_v7 = vmul.f32 %v1303_v61, %v958_v2 }
 0xb47   :  { %1009 = vst.msk [vmem:[#allocation7] sm:$0xff] %vm86_vm0, %v1005_v63  ;;  %v999_v8 = vmul.f32 %v996_v53, %v991_v1 }
 0xb48   :  { %v1305_v9 = vpop.eup %1304  ;;  %v998_v10 = vmul.f32 %v996_v53, %v990_v7 }
 0xb49   :  { %v1007_v12 = vadd.f32 %v1004_v56, %v999_v8  ;;  %v992_v13 = vmul.f32 %v1305_v9, %v960_v29 }
 0xb4a   :  { %v1006_v50 = vadd.f32 %v1004_v56, %v998_v10 }
 0xb4b   :  { %1011 = vst.msk [vmem:[#allocation7 + $0x10] sm:$0xff] %vm86_vm0, %v1007_v12  ;;  %v1000_v52 = vmul.f32 %v996_v53, %v992_v13 }
 0xb4c   :  { %1010 = vst.msk [vmem:[#allocation7 + $0x8] sm:$0xff] %vm86_vm0, %v1006_v50 }
 0xb4d   :  { %v1008_v14 = vadd.f32 %v1004_v56, %v1000_v52 }
 0xb4f   :  { %1012 = vst.msk [vmem:[#allocation7 + $0x18] sm:$0xff] %vm86_vm0, %v1008_v14 }
 0xb50   :  { %1377 = shalt.err (!%p1374_p5)
}
 0xb51   :  { %1024 = dma.vmem_to_hbm [thread:$0]  %s1019_s28, 512, %s1694_s9, [#allocation4], %s1402_s25, %s1402_s25, %s1403_s26  }
 0xb52   :  { %1390 = dma.done.wait [#allocation4], 512  }
 0xb53   :  { %1391 = vsyncadd [#allocation4], 4294966784 }
 0xb54   :  { %1392 = dma.done.wait [#allocation9], 512  }
 0xb55   :  { %1393 = vsyncadd [#allocation9], 4294966784 }
 0xb56   :  { %1043 = vsyncpa [#allocation3], 1 }
 0xb57   :  { %1044 = vsyncpa [#allocation6], 1 }
 0xb58   :  { %1045 = vsyncpa [#allocation4], 1 }
 0xb59   :  { %1046 = vsyncpa [#allocation9], 1 }

</bundles_post_ra>
